<compile_context>
chip_gen: v7x
topology: tpu7x:2x2x1
jax: 0.10.0
libtpu: 0.0.40
codegen_flags: <defaults>
</compile_context>

<pallas_src>
import functools

import jax
import jax.numpy as jnp
from jax.experimental import pallas as pl
from jax.experimental.pallas import tpu as pltpu


_VMEM_INPUT_BUDGET = 16 * 1024 * 1024  # cos+phi, double-buffered (bytes)


def _angle_loss_kernel(cos_ref, phi_ref, tgt_ref, loss_ref,
                       m_scr, l_scr, t_scr,
                       *, scale, gamma, batch, num_cls, tb, tc):
    ci = pl.program_id(1)
    nc = pl.num_programs(1)

    @pl.when(ci == 0)
    def _init():
        m_scr[...] = jnp.full((tb, 1), -jnp.inf, jnp.float32)   # running max
        l_scr[...] = jnp.zeros((tb, 1), jnp.float32)            # running sum of exp
        t_scr[...] = jnp.zeros((tb, 1), jnp.float32)            # target-class logit

    cos = cos_ref[...]            # (tb, tc) f32
    phi = phi_ref[...]            # (tb, tc) f32
    tgt = tgt_ref[...]            # (tb, 1)  i32

    # Global class indices of this C block; boolean one-hot mask (no f32 one-hot).
    cls_idx = ci * tc + jax.lax.broadcasted_iota(jnp.int32, (tb, tc), 1)
    tmask = cls_idx == tgt

    # Margin blend only at the target class: cos + (phi - cos) / (1 + lamb).
    blended = jnp.where(tmask, cos + (phi - cos) * scale, cos)

    # Mask padded class columns of a partial last block out of the softmax.
    if num_cls % tc != 0:
        blended = jnp.where(cls_idx < num_cls, blended, -jnp.inf)

    # Gather the (blended) target logit; the target lands in exactly one C block.
    t_scr[...] += jnp.sum(jnp.where(tmask, blended, 0.0), axis=1, keepdims=True)

    # Online logsumexp over the class axis.
    m_prev = m_scr[...]
    m_new = jnp.maximum(m_prev, jnp.max(blended, axis=1, keepdims=True))
    l_scr[...] = l_scr[...] * jnp.exp(m_prev - m_new) + jnp.sum(
        jnp.exp(blended - m_new), axis=1, keepdims=True)
    m_scr[...] = m_new

    @pl.when(ci == nc - 1)
    def _finalize():
        logpt = t_scr[...] - (m_scr[...] + jnp.log(l_scr[...]))   # (tb, 1)
        if gamma == 0:
            per_ex = -logpt                                       # (1 - pt)**0 == 1
        else:
            pt = jnp.exp(logpt)
            per_ex = -((1.0 - pt) ** gamma) * logpt
        if batch % tb != 0:
            row_idx = pl.program_id(0) * tb + jax.lax.broadcasted_iota(
                jnp.int32, (tb, 1), 0)
            per_ex = jnp.where(row_idx < batch, per_ex, 0.0)      # zero padded rows
        loss_ref[...] = per_ex


def _tile_sizes(batch, num_cls):
    """Pick (tb, tc) that satisfy the (8,128)/full-dim block rule and the VMEM budget."""
    if num_cls <= 4096:
        tc = num_cls                      # full rows (block dim == array dim is legal)
    else:
        tc = 2048                         # multiple of 128 -> legal class tile
    bytes_per_row = 2 * 2 * tc * 4        # cos+phi, double-buffered, f32
    tb = max(8, (_VMEM_INPUT_BUDGET // bytes_per_row) // 8 * 8)
    if batch >= 16:
        # Keep >= 2 batch blocks so the "parallel" axis can split across v7x's 2 TCs.
        half = -(-batch // 2)
        half = -(-half // 8) * 8
        tb = min(tb, half)
    if tb >= batch:
        tb = batch                        # single batch block (full-dim block is legal)
    return tb, tc


def angle_loss(cos_theta, phi_theta, xlen, target, *, it=1, gamma=0,
               lambda_min=5.0, lambda_max=1500.0):
    """Pallas TPU implementation of AngleLoss.forward.

    cos_theta, phi_theta: (B, num_cls) float32
    xlen:                 (B,) float32 -- dead code in the reference forward; ignored.
    target:               (B,) int32 class indices
    it:                   Python int iteration counter (module increments before use);
                          must be a static Python value (lamb uses Python max()).
    """
    del xlen  # `feat = cos_theta / xlen` is computed then never used in the reference.

    cos_theta = jnp.asarray(cos_theta, jnp.float32)
    phi_theta = jnp.asarray(phi_theta, jnp.float32)
    B, C = cos_theta.shape
    tgt2d = jnp.asarray(target, jnp.int32).reshape(B, 1)

    lamb = max(lambda_min, lambda_max / (1.0 + 0.001 * it))
    scale = 1.0 / (1.0 + lamb)            # compile-time constant baked into the kernel

    tb, tc = _tile_sizes(B, C)
    grid = (pl.cdiv(B, tb), pl.cdiv(C, tc))

    kernel = functools.partial(
        _angle_loss_kernel, scale=scale, gamma=gamma,
        batch=B, num_cls=C, tb=tb, tc=tc)

    per_ex = pl.pallas_call(
        kernel,
        out_shape=jax.ShapeDtypeStruct((B, 1), jnp.float32),
        grid_spec=pltpu.PrefetchScalarGridSpec(
            num_scalar_prefetch=0,
            grid=grid,
            in_specs=[
                pl.BlockSpec((tb, tc), lambda i, c: (i, c)),   # cos_theta
                pl.BlockSpec((tb, tc), lambda i, c: (i, c)),   # phi_theta
                pl.BlockSpec((tb, 1), lambda i, c: (i, 0)),    # target
            ],
            out_specs=pl.BlockSpec((tb, 1), lambda i, c: (i, 0)),
            scratch_shapes=[
                pltpu.VMEM((tb, 1), jnp.float32),   # running max
                pltpu.VMEM((tb, 1), jnp.float32),   # running sum-of-exp
                pltpu.VMEM((tb, 1), jnp.float32),   # target logit
            ]),
        compiler_params=pltpu.CompilerParams(
            dimension_semantics=("parallel", "arbitrary"),
            vmem_limit_bytes=32 * 1024 * 1024),
        cost_estimate=pl.CostEstimate(
            flops=int(8 * B * C),
            transcendentals=int(B * C + 2 * B),
            bytes_accessed=int((2 * B * C + 3 * B) * 4)),
    )(cos_theta, phi_theta, tgt2d)

    return jnp.sum(per_ex) / B


def _angle_loss_ref(cos_theta, phi_theta, xlen, target, *, it=1, gamma=0,
                    lambda_min=5.0, lambda_max=1500.0):
    """Pure-JAX reference mirroring the PyTorch forward."""
    del xlen
    B, C = cos_theta.shape
    lamb = max(lambda_min, lambda_max / (1.0 + 0.001 * it))
    onehot = jax.nn.one_hot(target, C, dtype=cos_theta.dtype)
    output = cos_theta + onehot * (phi_theta - cos_theta) / (1.0 + lamb)
    log_sm = jax.nn.log_softmax(output, axis=1)
    logpt = jnp.sum(log_sm * onehot, axis=1)
    pt = jnp.exp(logpt)
    loss = -1.0 * (1.0 - pt) ** gamma * logpt
    return jnp.mean(loss)


if __name__ == "__main__":
    key = jax.random.PRNGKey(0)
    B, num_cls = 8, 10
    k1, k2, k3, k4 = jax.random.split(key, 4)

    # cos_theta in [-1, 1], phi_theta in [-3, 1] (psi of A-Softmax), xlen > 0
    cos_theta = jax.random.uniform(k1, (B, num_cls), jnp.float32, minval=-1.0, maxval=1.0)
    phi_theta = jax.random.uniform(k2, (B, num_cls), jnp.float32, minval=-3.0, maxval=1.0)
    xlen = jax.random.uniform(k3, (B,), jnp.float32, minval=0.5, maxval=5.0)
    target = jax.random.randint(k4, (B,), 0, num_cls, dtype=jnp.int32)

    loss = angle_loss(cos_theta, phi_theta, xlen, target, it=1, gamma=0)
    loss = jax.block_until_ready(loss)

    ref = _angle_loss_ref(cos_theta, phi_theta, xlen, target, it=1, gamma=0)
    assert jnp.allclose(loss, ref, rtol=1e-5, atol=1e-5), (loss, ref)

    print("KERNEL_OK")
</pallas_src>

<mosaic_0001>
module attributes {stable_mosaic.version = 11 : i64} {
  func.func @_angle_loss_kernel(%arg0: i32, %arg1: i32, %arg2: memref<8x10xf32, #tpu.memory_space<vmem>>, %arg3: memref<8x10xf32, #tpu.memory_space<vmem>>, %arg4: memref<8x1xi32, #tpu.memory_space<vmem>>, %arg5: memref<8x1xf32, #tpu.memory_space<vmem>>, %arg6: memref<8x1xf32, #tpu.memory_space<vmem>>, %arg7: memref<8x1xf32, #tpu.memory_space<vmem>>, %arg8: memref<8x1xf32, #tpu.memory_space<vmem>>) attributes {dimension_semantics = [#tpu.dimension_semantics<parallel>, #tpu.dimension_semantics<arbitrary>], iteration_bounds = array<i64: 1, 1>, scalar_prefetch = 0 : i64, scratch_operands = 3 : i64, tpu.core_type = #tpu.core_type<tc>, window_params = [{transform_indices = @transform_0, window_bounds = array<i64: 8, 10>}, {transform_indices = @transform_1, window_bounds = array<i64: 8, 10>}, {transform_indices = @transform_2, window_bounds = array<i64: 8, 1>}, {transform_indices = @transform_3, window_bounds = array<i64: 8, 1>}]} {
    %c0_i32 = arith.constant 0 : i32
    %0 = arith.cmpi eq, %arg1, %c0_i32 : i32
    %1 = arith.extui %0 : i1 to i32
    %c0_i32_0 = arith.constant 0 : i32
    %2 = arith.cmpi ne, %1, %c0_i32_0 : i32
    scf.if %2 {
      %cst_24 = arith.constant 0xFF800000 : f32
      %43 = vector.broadcast %cst_24 : f32 to vector<8x1xf32>
      %c0_25 = arith.constant 0 : index
      %c0_26 = arith.constant 0 : index
      %44 = vector.load %arg6[%c0_25, %c0_26] : memref<8x1xf32, #tpu.memory_space<vmem>>, vector<8x1xf32>
      tpu.vector_store %arg6[%c0_25, %c0_26], %43 {strides = array<i32>} : memref<8x1xf32, #tpu.memory_space<vmem>>, vector<8x1xf32>,
      %cst_27 = arith.constant 0.000000e+00 : f32
      %45 = vector.broadcast %cst_27 : f32 to vector<8x1xf32>
      %c0_28 = arith.constant 0 : index
      %c0_29 = arith.constant 0 : index
      %46 = vector.load %arg7[%c0_28, %c0_29] : memref<8x1xf32, #tpu.memory_space<vmem>>, vector<8x1xf32>
      tpu.vector_store %arg7[%c0_28, %c0_29], %45 {strides = array<i32>} : memref<8x1xf32, #tpu.memory_space<vmem>>, vector<8x1xf32>,
      %cst_30 = arith.constant 0.000000e+00 : f32
      %47 = vector.broadcast %cst_30 : f32 to vector<8x1xf32>
      %c0_31 = arith.constant 0 : index
      %c0_32 = arith.constant 0 : index
      %48 = vector.load %arg8[%c0_31, %c0_32] : memref<8x1xf32, #tpu.memory_space<vmem>>, vector<8x1xf32>
      tpu.vector_store %arg8[%c0_31, %c0_32], %47 {strides = array<i32>} : memref<8x1xf32, #tpu.memory_space<vmem>>, vector<8x1xf32>,
    } else {
    }
    %c0 = arith.constant 0 : index
    %c0_1 = arith.constant 0 : index
    %3 = vector.load %arg2[%c0, %c0_1] : memref<8x10xf32, #tpu.memory_space<vmem>>, vector<8x10xf32>
    %c0_2 = arith.constant 0 : index
    %c0_3 = arith.constant 0 : index
    %4 = vector.load %arg3[%c0_2, %c0_3] : memref<8x10xf32, #tpu.memory_space<vmem>>, vector<8x10xf32>
    %c0_4 = arith.constant 0 : index
    %c0_5 = arith.constant 0 : index
    %5 = vector.load %arg4[%c0_4, %c0_5] : memref<8x1xi32, #tpu.memory_space<vmem>>, vector<8x1xi32>
    %c10_i32 = arith.constant 10 : i32
    %6 = arith.muli %arg1, %c10_i32 : i32
    %7 = tpu.iota {dimensions = array<i32: 1>} : vector<8x10xi32>
    %8 = vector.broadcast %6 : i32 to vector<8x10xi32>
    %9 = arith.addi %8, %7 : vector<8x10xi32>
    %10 = vector.broadcast %5 : vector<8x1xi32> to vector<8x10xi32>
    %11 = arith.cmpi eq, %9, %10 : vector<8x10xi32>
    %12 = arith.subf %4, %3 : vector<8x10xf32>
    %cst = arith.constant 6.66888314E-4 : f32
    %13 = vector.broadcast %cst : f32 to vector<8x10xf32>
    %14 = arith.mulf %12, %13 : vector<8x10xf32>
    %15 = arith.addf %3, %14 : vector<8x10xf32>
    %16 = arith.select %11, %15, %3 : vector<8x10xi1>, vector<8x10xf32>
    %c0_6 = arith.constant 0 : index
    %c0_7 = arith.constant 0 : index
    %17 = vector.load %arg8[%c0_6, %c0_7] : memref<8x1xf32, #tpu.memory_space<vmem>>, vector<8x1xf32>
    %cst_8 = arith.constant 0.000000e+00 : f32
    %18 = vector.broadcast %cst_8 : f32 to vector<8x10xf32>
    %19 = arith.select %11, %16, %18 : vector<8x10xi1>, vector<8x10xf32>
    %cst_9 = arith.constant dense<0.000000e+00> : vector<8xf32>
    %20 = vector.multi_reduction <add>, %19, %cst_9 [1] : vector<8x10xf32> to vector<8xf32>
    %21 = vector.shape_cast %20 : vector<8xf32> to vector<8x1xf32>
    %22 = arith.addf %17, %21 : vector<8x1xf32>
    %c0_10 = arith.constant 0 : index
    %c0_11 = arith.constant 0 : index
    %23 = vector.load %arg8[%c0_10, %c0_11] : memref<8x1xf32, #tpu.memory_space<vmem>>, vector<8x1xf32>
    tpu.vector_store %arg8[%c0_10, %c0_11], %22 {strides = array<i32>} : memref<8x1xf32, #tpu.memory_space<vmem>>, vector<8x1xf32>,
    %c0_12 = arith.constant 0 : index
    %c0_13 = arith.constant 0 : index
    %24 = vector.load %arg6[%c0_12, %c0_13] : memref<8x1xf32, #tpu.memory_space<vmem>>, vector<8x1xf32>
    %cst_14 = arith.constant dense<0xFF800000> : vector<8xf32>
    %25 = vector.multi_reduction <maximumf>, %16, %cst_14 [1] : vector<8x10xf32> to vector<8xf32>
    %26 = vector.shape_cast %25 : vector<8xf32> to vector<8x1xf32>
    %27 = arith.maximumf %24, %26 : vector<8x1xf32>
    %c0_15 = arith.constant 0 : index
    %c0_16 = arith.constant 0 : index
    %28 = vector.load %arg7[%c0_15, %c0_16] : memref<8x1xf32, #tpu.memory_space<vmem>>, vector<8x1xf32>
    %29 = arith.subf %24, %27 : vector<8x1xf32>
    %30 = math.exp %29 : vector<8x1xf32>
    %31 = arith.mulf %28, %30 : vector<8x1xf32>
    %32 = vector.broadcast %27 : vector<8x1xf32> to vector<8x10xf32>
    %33 = arith.subf %16, %32 : vector<8x10xf32>
    %34 = math.exp %33 : vector<8x10xf32>
    %cst_17 = arith.constant dense<0.000000e+00> : vector<8xf32>
    %35 = vector.multi_reduction <add>, %34, %cst_17 [1] : vector<8x10xf32> to vector<8xf32>
    %36 = vector.shape_cast %35 : vector<8xf32> to vector<8x1xf32>
    %37 = arith.addf %31, %36 : vector<8x1xf32>
    %c0_18 = arith.constant 0 : index
    %c0_19 = arith.constant 0 : index
    %38 = vector.load %arg7[%c0_18, %c0_19] : memref<8x1xf32, #tpu.memory_space<vmem>>, vector<8x1xf32>
    tpu.vector_store %arg7[%c0_18, %c0_19], %37 {strides = array<i32>} : memref<8x1xf32, #tpu.memory_space<vmem>>, vector<8x1xf32>,
    %c0_20 = arith.constant 0 : index
    %c0_21 = arith.constant 0 : index
    %39 = vector.load %arg6[%c0_20, %c0_21] : memref<8x1xf32, #tpu.memory_space<vmem>>, vector<8x1xf32>
    tpu.vector_store %arg6[%c0_20, %c0_21], %27 {strides = array<i32>} : memref<8x1xf32, #tpu.memory_space<vmem>>, vector<8x1xf32>,
    %c0_i32_22 = arith.constant 0 : i32
    %40 = arith.cmpi eq, %arg1, %c0_i32_22 : i32
    %41 = arith.extui %40 : i1 to i32
    %c0_i32_23 = arith.constant 0 : i32
    %42 = arith.cmpi ne, %41, %c0_i32_23 : i32
    scf.if %42 {
      %c0_24 = arith.constant 0 : index
      %c0_25 = arith.constant 0 : index
      %43 = vector.load %arg8[%c0_24, %c0_25] : memref<8x1xf32, #tpu.memory_space<vmem>>, vector<8x1xf32>
      %c0_26 = arith.constant 0 : index
      %c0_27 = arith.constant 0 : index
      %44 = vector.load %arg6[%c0_26, %c0_27] : memref<8x1xf32, #tpu.memory_space<vmem>>, vector<8x1xf32>
      %c0_28 = arith.constant 0 : index
      %c0_29 = arith.constant 0 : index
      %45 = vector.load %arg7[%c0_28, %c0_29] : memref<8x1xf32, #tpu.memory_space<vmem>>, vector<8x1xf32>
      %46 = math.log %45 : vector<8x1xf32>
      %47 = arith.addf %44, %46 : vector<8x1xf32>
      %48 = arith.subf %43, %47 : vector<8x1xf32>
      %cst_30 = arith.constant 0.000000e+00 : f32
      %49 = vector.broadcast %cst_30 : f32 to vector<8x1xf32>
      %50 = arith.subf %49, %48 : vector<8x1xf32>
      %c0_31 = arith.constant 0 : index
      %c0_32 = arith.constant 0 : index
      %51 = vector.load %arg5[%c0_31, %c0_32] : memref<8x1xf32, #tpu.memory_space<vmem>>, vector<8x1xf32>
      tpu.vector_store %arg5[%c0_31, %c0_32], %50 {strides = array<i32>} : memref<8x1xf32, #tpu.memory_space<vmem>>, vector<8x1xf32>,
    } else {
    }
    return
  }
  func.func @transform_0(%arg0: i32, %arg1: i32) -> (i32, i32) {
    %c0_i32 = arith.constant 0 : i32
    return %arg0, %arg1 : i32, i32
  }
  func.func @transform_1(%arg0: i32, %arg1: i32) -> (i32, i32) {
    %c0_i32 = arith.constant 0 : i32
    return %arg0, %arg1 : i32, i32
  }
  func.func @transform_2(%arg0: i32, %arg1: i32) -> (i32, i32) {
    %c0_i32 = arith.constant 0 : i32
    %c0_i32_0 = arith.constant 0 : i32
    return %arg0, %c0_i32 : i32, i32
  }
  func.func @transform_3(%arg0: i32, %arg1: i32) -> (i32, i32) {
    %c0_i32 = arith.constant 0 : i32
    %c0_i32_0 = arith.constant 0 : i32
    return %arg0, %c0_i32 : i32, i32
  }
}

</mosaic_0001>

<bundles_post_ra>
// kernel: tpu_custom_call.1
= control target key start
LH: loop header
LB: loop body
LE: loop exit
PB: predicated region body
PF: predicated region fallthrough
CT: control target
= control target key end

     0   :  { %8 = vsyncpa [#allocation6], 0  ;;  %s136_s12 = smov [#allocation5]   ;;  %s191_s0 = inlined_call_operand.vmem [shape: f32[8,10], index: 0, kind: input, shape index: {}]   ;;  %s192_s1 = inlined_call_operand.hbm [shape: f32[8,10], index: 1, kind: input, shape index: {}]   ;;  %s193_s2 = inlined_call_operand.vmem [shape: s32[8,1], index: 2, kind: input, shape index: {}]   ;;  %s194_s3 = inlined_call_operand.vmem [shape: f32[8,1], index: 3, kind: output, shape index: {}]  }
   0x1   :  { %s17_s13 = sshll.u32 %s136_s12, 4  ;;  %s112_s16 = scalar_lea.hbm %s192_s1, 128  ;;  %s18_s13 = int_to_ptr.vmem [resolvable:$true] %s17_s13 }
   0x2   :  { %p113_p0 = scmp.ne.s32.totalorder %s192_s1, %s112_s16  ;;  %p116_p1 = scmp.lt.u32.totalorder %s112_s16, %s192_s1 }
   0x4   :  { %p118_p2 = pnand %p116_p1, %p113_p0 }
   0x6   :  { %121 = shalt.err (!%p118_p2)
}
   0x7   :  { %s122_s21 = scalar_lea.vmem %s18_s13, 128  ;;  %p127_p4 = scmp.lt.s32.totalorder %s18_s13, %s18_s13 }
   0x8   :  { %p123_p3 = scmp.ne.s32.totalorder %s18_s13, %s122_s21  ;;  %p128_p5 = scmp.lt.s32.totalorder %s122_s21, %s122_s21 }
   0xa   :  { %p129_p6 = por %p128_p5, %p127_p4 }
   0xc   :  { %p130_p7 = pnand %p129_p6, %p123_p3 }
   0xe   :  { %133 = shalt.err (!%p130_p7)
}
   0xf   :  { %20 = dma.hbm_to_vmem [thread:$0]  %s192_s1, 128, %s18_s13, [#allocation6]  }
  0x10   :  { %134 = dma.done.wait [#allocation6], 128  }
  0x11   :  { %135 = vsyncadd [#allocation6], 4294967168  ;;  %v137_v0 = vmov 0   ;;  %v36_v1 = vld [vmem:[%s193_s2] sm:$0xff]  ;;  %vm30_vm0 = vcmask 7168   ;;  %v138_v2 = vmov -inf   ;;  %v38_v6 = vlaneseq }
  0x12   :  { %104 = vset.pattern.permute.xlu0 %v137_v0  ;;  %105 = vset.pattern.permute.xlu1 %v137_v0  ;;  %31 = vst.msk [vmem:[#allocation2] sm:$0xff] %vm30_vm0, %v138_v2  ;;  %v34_v3 = vld [vmem:[%s191_s0] sm:$0xff]  ;;  %v35_v4 = vld [vmem:[#allocation5] sm:$0xff]  ;;  %vm52_vm1 = vcmask 80896   ;;  %v139_v15 = vmov 0.0  }
  0x13   :  { %43 = vperm.xlu0 %104, %v36_v1   ;;  %v46_v5 = vsub.f32 %v35_v4, %v34_v3  ;;  %v39_v8 = vand.u32 127, %v38_v6  ;;  %33 = vst.msk [vmem:[#allocation4] sm:$0xff] %vm30_vm0, %v139_v15  ;;  %32 = vst.msk [vmem:[#allocation3] sm:$0xff] %vm30_vm0, %v139_v15 }
  0x15   :  { %v47_v7 = vmul.f32 0.0006668883, %v46_v5 }
  0x17   :  { %v48_v9 = vadd.f32 %v47_v7, %v34_v3 }
  0x19   :  { %v59_v16 = vld [vmem:[#allocation2] sm:$0xff] }
  0x1a   :  { %v50_v19 = vld [vmem:[#allocation4] sm:$0xff]  ;;  %v64_v30 = vld [vmem:[#allocation3] sm:$0xff] }
  0x92   :  { %v44_v10 = vpop.permute.xlu0 %43 }
  0x93   :  { %vm45_vm2 = vcmp.eq.s32.totalorder %v39_v8, %v44_v10 }
  0x94   :  { %v49_v11 = vsel %vm45_vm2, %v48_v9, %v34_v3  ;;  %v51_v13 = vsel %vm45_vm2, %v48_v9, 0.0 }
  0x95   :  { %v60_v12 = vsel %vm52_vm1, %v49_v11, -inf  ;;  %v53_v14 = vsel %vm52_vm1, %v51_v13, 0.0 }
  0x96   :  { %61 = vmax.xlane.f32.xlu0 %v60_v12 }
  0x9a   :  { %54 = vadd.xlane.f32.xlu0 %v53_v14 }
 0x123   :  { %v62_v17 = vpop.xlane.xlu0 %61 }
 0x124   :  { %v63_v18 = vmax.f32 %v59_v16, %v62_v17 }
 0x126   :  { %v65_v20 = vsub.f32 %v59_v16, %v63_v18  ;;  %82 = vst.msk [vmem:[#allocation2] sm:$0xff] %vm30_vm0, %v63_v18  ;;  %71 = vperm.xlu1 %105, %v63_v18  }
 0x127   :  { %v55_v21 = vpop.xlane.xlu0 %54 }
 0x128   :  { %v56_v22 = vadd.f32 %v55_v21, %v50_v19  ;;  %v66_v28 = vmul.f32 1.442695, %v65_v20 }
 0x12a   :  { %58 = vst.msk [vmem:[#allocation4] sm:$0xff] %vm30_vm0, %v56_v22 }
 0x12d   :  { %v87_v37 = vld [vmem:[#allocation2] sm:$0xff] }
 0x131   :  { %v86_v39 = vld [vmem:[#allocation4] sm:$0xff] }
 0x1a5   :  { %v72_v23 = vpop.permute.xlu1 %71 }
 0x1a6   :  { %v74_v24 = vsub.f32 %v49_v11, %v72_v23 }
 0x1a8   :  { %v75_v25 = vmul.f32 1.442695, %v74_v24 }
 0x1aa   :  { %106 = vpow2.f32 %v75_v25 }
 0x1ab   :  { %108 = vpow2.f32 %v66_v28 }
 0x1b4   :  { %v107_v26 = vpop.eup %106 }
 0x1b5   :  { %v77_v27 = vsel %vm52_vm1, %v107_v26, 0.0  ;;  %v109_v29 = vpop.eup %108 }
 0x1b6   :  { %78 = vadd.xlane.f32.xlu1 %v77_v27  ;;  %v68_v31 = vmul.f32 %v109_v29, %v64_v30 }
 0x243   :  { %v79_v32 = vpop.xlane.xlu1 %78 }
 0x244   :  { %v80_v33 = vadd.f32 %v79_v32, %v68_v31 }
 0x246   :  { %81 = vst.msk [vmem:[#allocation3] sm:$0xff] %vm30_vm0, %v80_v33 }
 0x24d   :  { %v88_v34 = vld [vmem:[#allocation3] sm:$0xff] }
 0x24e   :  { %110 = vlog2.f32 %v88_v34 }
 0x258   :  { %v111_v35 = vpop.eup %110 }
 0x259   :  { %v90_v36 = vmul.f32 0.6931472, %v111_v35 }
 0x25b   :  { %v91_v38 = vadd.f32 %v90_v36, %v87_v37 }
 0x25d   :  { %v92_v40 = vsub.f32 %v86_v39, %v91_v38 }
 0x25f   :  { %v93_v41 = vsub.f32 0.0, %v92_v40 }
 0x261   :  { %94 = vst.msk [vmem:[%s194_s3] sm:$0xff] %vm30_vm0, %v93_v41 }
 0x262   :  { %99 = vsyncpa [#allocation6], 1 }

</bundles_post_ra>
